<compile_context>
chip_gen: v7x
topology: tpu7x:2x2x1
jax: 0.10.0
libtpu: 0.0.40
codegen_flags: <defaults>
</compile_context>

<pallas_src>
import functools

import jax
import jax.numpy as jnp
from jax.experimental import pallas as pl
from jax.experimental.pallas import tpu as pltpu

# loss-combination weights (the module has no learned parameters)
SIM_W, CONT_W, GENRE_W, NET_W = 1.0, 0.5, 0.3, 0.2


def _bce_with_logits(x, y):
    # numerically stable BCEWithLogits, elementwise
    return jnp.maximum(x, 0.0) - x * y + jnp.log1p(jnp.exp(-jnp.abs(x)))


def _graph_loss_kernel(sim3_ref, neg_ref, gx_ref, gy_ref, nl_ref, lbl_ref,
                       acc_ref, *, batch):
    """Grid = (n_split [parallel], tiles_per_split [arbitrary]).

    acc_ref is an (8, TB) per-split output block, resident across the
    reduction axis: rows 0..3 hold per-lane partial sums for
    (sim, contrastive, genre, network); rows 4..7 stay zero.
    """
    s = pl.program_id(0)
    i = pl.program_id(1)
    n_i = pl.num_programs(1)
    tb = sim3_ref.shape[-1]

    @pl.when(i == 0)
    def _init():
        acc_ref[...] = jnp.zeros_like(acc_ref)

    # valid-lane mask for this tile (excludes batch padding), shape (1, TB)
    tile = s * n_i + i
    col = jax.lax.broadcasted_iota(jnp.int32, (1, tb), 1) + tile * tb
    valid = (col < batch).astype(jnp.float32)

    # ---- stacked single-row operands: sim logits, sim labels, pos logit ----
    sim3 = sim3_ref[...].astype(jnp.float32)          # (3, TB)
    sx = sim3[0:1, :]
    sy = sim3[1:2, :]
    pos = sim3[2:3, :]

    # similarity: BCE with logits (already per-lane row)
    sim_vec = _bce_with_logits(sx, sy)                # (1, TB)

    # contrastive: cross-entropy over [pos, negatives], target class 0
    neg = neg_ref[...].astype(jnp.float32)            # (K, TB)
    m = jnp.maximum(jnp.max(neg, axis=0, keepdims=True), pos)
    lse = m + jnp.log(jnp.exp(pos - m)
                      + jnp.sum(jnp.exp(neg - m), axis=0, keepdims=True))
    cont_vec = lse - pos                              # (1, TB)

    # genre: BCE with logits, reduce over genres FIRST, mask once afterwards
    gx = gx_ref[...].astype(jnp.float32)              # (G, TB)
    gy = gy_ref[...].astype(jnp.float32)              # (G, TB) (bf16 stream ok)
    gen_vec = jnp.sum(_bce_with_logits(gx, gy), axis=0, keepdims=True)

    # network: cross-entropy with integer labels (iota==label select)
    nl = nl_ref[...].astype(jnp.float32)              # (C, TB)
    lbl = lbl_ref[...]                                # (1, TB) int32
    n_classes = nl.shape[0]
    cls = jax.lax.broadcasted_iota(jnp.int32, (n_classes, tb), 0)
    tgt = jnp.sum(jnp.where(cls == lbl, nl, 0.0), axis=0, keepdims=True)
    nm = jnp.max(nl, axis=0, keepdims=True)
    nlse = nm + jnp.log(jnp.sum(jnp.exp(nl - nm), axis=0, keepdims=True))
    net_vec = nlse - tgt                              # (1, TB)

    # ---- mask once per loss, accumulate per-lane partials (pure VPU adds) --
    acc_ref[0:1, :] += sim_vec * valid
    acc_ref[1:2, :] += cont_vec * valid
    acc_ref[2:3, :] += gen_vec * valid
    acc_ref[3:4, :] += net_vec * valid
    # Final cross-lane / cross-split reduce + normalization happens in the
    # wrapper epilogue (keeps the per-step body free of XLU/SMEM sync).


def _pad_lanes(x, b_pad):
    b = x.shape[-1]
    if b == b_pad:
        return x
    return jnp.pad(x, ((0, 0), (0, b_pad - b)))


def graph_loss(outputs, similarity_labels, genre_labels, network_labels,
               negative_samples, *, tile_b=8192, num_splits=2):
    """Pallas-backed GraphLoss forward.  Returns dict of scalar losses."""
    # ---- lane-dense layout: batch -> last (lane) axis everywhere -----------
    sim_x = outputs["similarity_scores"].reshape(-1)          # (B,)
    pos = outputs["contrastive_logits"].reshape(-1)           # (B,)
    sim_y = similarity_labels
    if not jnp.issubdtype(sim_y.dtype, jnp.floating):
        sim_y = sim_y.astype(jnp.bfloat16)                    # 0/1 exact in bf16
    row_dt = jnp.promote_types(jnp.promote_types(sim_x.dtype, pos.dtype),
                               sim_y.dtype)
    stacked = jnp.stack([sim_x.astype(row_dt), sim_y.astype(row_dt),
                         pos.astype(row_dt)], axis=0)         # (3, B)

    neg = jnp.transpose(negative_samples)                     # (K, B)
    genre_x = jnp.transpose(outputs["genre_logits"])          # (G, B)
    gy = genre_labels
    if not jnp.issubdtype(gy.dtype, jnp.floating):
        gy = gy.astype(jnp.bfloat16)                          # narrow label stream
    genre_y = jnp.transpose(gy)                               # (G, B)
    net_logits = jnp.transpose(outputs["network_logits"])     # (C, B)
    net_lbl = network_labels.reshape(1, -1).astype(jnp.int32)  # (1, B)

    batch = stacked.shape[-1]
    n_genres = genre_x.shape[0]

    # ---- pick the lane tile: as large as possible within a VMEM budget -----
    bytes_per_lane = (stacked.shape[0] * stacked.dtype.itemsize
                      + neg.shape[0] * neg.dtype.itemsize
                      + genre_x.shape[0] * genre_x.dtype.itemsize
                      + genre_y.shape[0] * genre_y.dtype.itemsize
                      + net_logits.shape[0] * net_logits.dtype.itemsize
                      + net_lbl.dtype.itemsize)
    vmem_per_lane = 2 * bytes_per_lane + 2 * 8 * 4   # double-buffered in + acc
    budget = 12 * 1024 * 1024                        # under v5e's 16MiB scoped
    max_tb = max(128, (budget // vmem_per_lane) // 128 * 128)
    tile_b = min(tile_b, max_tb)

    if batch <= tile_b:
        tb, n_tiles = batch, 1
    else:
        tb = max(128, (tile_b // 128) * 128)         # lane tiles must be /128
        n_tiles = -(-batch // tb)
    n_split = num_splits if n_tiles >= num_splits else 1
    tiles_per_split = -(-n_tiles // n_split)
    b_pad = n_split * tiles_per_split * tb

    inputs = [stacked, neg, genre_x, genre_y, net_logits, net_lbl]
    inputs = [_pad_lanes(x, b_pad) for x in inputs]

    def in_spec(rows):
        return pl.BlockSpec((rows, tb),
                            lambda s, i: (0, s * tiles_per_split + i))

    in_specs = [in_spec(x.shape[0]) for x in inputs]

    # per-split (8, tb) accumulator block (rows 0..3 used), parallel-safe
    out_shape = jax.ShapeDtypeStruct((n_split * 8, tb), jnp.float32)
    out_spec = pl.BlockSpec((8, tb), lambda s, i: (s, 0))

    n_elems = sum(int(x.size) for x in inputs)
    bytes_accessed = (sum(int(x.size) * x.dtype.itemsize for x in inputs)
                      + n_split * 8 * tb * 4)
    cost = pl.CostEstimate(flops=8 * n_elems,
                           transcendentals=2 * n_elems,
                           bytes_accessed=bytes_accessed)

    kernel = functools.partial(_graph_loss_kernel, batch=batch)

    acc = pl.pallas_call(
        kernel,
        grid=(n_split, tiles_per_split),
        in_specs=in_specs,
        out_specs=out_spec,
        out_shape=out_shape,
        compiler_params=pltpu.CompilerParams(
            dimension_semantics=("parallel", "arbitrary")),
        cost_estimate=cost,
    )(*inputs)

    # ---- tiny epilogue: cross-split/lane sum, normalization, weighting -----
    acc = acc.reshape(n_split, 8, tb)[:, :4, :]
    sums = jnp.sum(acc, axis=(0, 2))                 # (4,)
    sim = sums[0] / batch
    cont = sums[1] / batch
    gen = sums[2] / (batch * n_genres)
    net = sums[3] / batch
    total = SIM_W * sim + CONT_W * cont + GENRE_W * gen + NET_W * net
    return {
        "similarity_loss": sim,
        "contrastive_loss": cont,
        "genre_loss": gen,
        "network_loss": net,
        "total_loss": total,
    }


def _reference(outputs, sim_y, genre_y, net_y, neg):
    """Pure-JAX reference mirroring the PyTorch module."""
    def bce(x, y):
        return jnp.mean(jnp.maximum(x, 0) - x * y + jnp.log1p(jnp.exp(-jnp.abs(x))))

    def ce(logits, labels):
        logz = jax.nn.logsumexp(logits, axis=-1)
        tgt = jnp.take_along_axis(logits, labels[:, None], axis=-1)[:, 0]
        return jnp.mean(logz - tgt)

    sim = bce(outputs["similarity_scores"].reshape(-1), sim_y.astype(jnp.float32))
    all_logits = jnp.concatenate(
        [outputs["contrastive_logits"].reshape(-1, 1), neg], axis=1)
    cont = ce(all_logits, jnp.zeros(all_logits.shape[0], jnp.int32))
    gen = bce(outputs["genre_logits"], genre_y.astype(jnp.float32))
    net = ce(outputs["network_logits"], net_y)
    total = SIM_W * sim + CONT_W * cont + GENRE_W * gen + NET_W * net
    return {"similarity_loss": sim, "contrastive_loss": cont,
            "genre_loss": gen, "network_loss": net, "total_loss": total}


def _make_inputs(key, B, K, G, C):
    ks = jax.random.split(key, 8)
    outputs = {
        "similarity_scores": jax.random.normal(ks[0], (B, 1), jnp.float32),
        "contrastive_logits": jax.random.normal(ks[1], (B,), jnp.float32),
        "genre_logits": jax.random.normal(ks[2], (B, G), jnp.float32),
        "network_logits": jax.random.normal(ks[3], (B, C), jnp.float32),
    }
    similarity_labels = jax.random.bernoulli(ks[4], 0.5, (B,)).astype(jnp.float32)
    genre_labels = jax.random.bernoulli(ks[5], 0.3, (B, G)).astype(jnp.float32)
    network_labels = jax.random.randint(ks[6], (B,), 0, C, jnp.int32)
    negative_samples = jax.random.normal(ks[7], (B, K), jnp.float32)
    return (outputs, similarity_labels, genre_labels, network_labels,
            negative_samples)


if __name__ == "__main__":
    key = jax.random.PRNGKey(0)

    # Case 1: tiny batch -> single tile (block == full array), one split.
    B, K, G, C = 8, 7, 16, 8
    args = _make_inputs(key, B, K, G, C)
    got = graph_loss(*args)
    got = {k: jax.block_until_ready(v) for k, v in got.items()}
    ref = _reference(*args)
    for k in ref:
        assert jnp.allclose(got[k], ref[k], atol=1e-5, rtol=1e-5), (
            k, got[k], ref[k])

    # Case 2: batch > tile -> 2-way parallel split + multi-tile grid with lane
    # padding/masking, plus narrow (int/bool) label dtypes.
    B2 = 300
    o2, sl2, gl2, nl2, ns2 = _make_inputs(jax.random.PRNGKey(1), B2, K, G, C)
    sl2 = sl2.astype(jnp.int32)    # integer similarity labels -> bf16 stream
    gl2 = gl2.astype(bool)         # bool genre labels         -> bf16 stream
    got2 = graph_loss(o2, sl2, gl2, nl2, ns2, tile_b=128)
    got2 = {k: jax.block_until_ready(v) for k, v in got2.items()}
    ref2 = _reference(o2, sl2, gl2, nl2, ns2)
    for k in ref2:
        assert jnp.allclose(got2[k], ref2[k], atol=1e-5, rtol=1e-5), (
            k, got2[k], ref2[k])

    print("KERNEL_OK")
</pallas_src>

<mosaic_0001>
module attributes {stable_mosaic.version = 11 : i64} {
  func.func @_graph_loss_kernel(%arg0: i32, %arg1: i32, %arg2: memref<3x8xf32, #tpu.memory_space<vmem>>, %arg3: memref<7x8xf32, #tpu.memory_space<vmem>>, %arg4: memref<16x8xf32, #tpu.memory_space<vmem>>, %arg5: memref<16x8xf32, #tpu.memory_space<vmem>>, %arg6: memref<8x8xf32, #tpu.memory_space<vmem>>, %arg7: memref<1x8xi32, #tpu.memory_space<vmem>>, %arg8: memref<8x8xf32, #tpu.memory_space<vmem>>) attributes {dimension_semantics = [#tpu.dimension_semantics<parallel>, #tpu.dimension_semantics<arbitrary>], iteration_bounds = array<i64: 1, 1>, scalar_prefetch = 0 : i64, scratch_operands = 0 : i64, tpu.core_type = #tpu.core_type<tc>, window_params = [{transform_indices = @transform_0, window_bounds = array<i64: 3, 8>}, {transform_indices = @transform_1, window_bounds = array<i64: 7, 8>}, {transform_indices = @transform_2, window_bounds = array<i64: 16, 8>}, {transform_indices = @transform_3, window_bounds = array<i64: 16, 8>}, {transform_indices = @transform_4, window_bounds = array<i64: 8, 8>}, {transform_indices = @transform_5, window_bounds = array<i64: 1, 8>}, {transform_indices = @transform_6, window_bounds = array<i64: 8, 8>}]} {
    %c0_i32 = arith.constant 0 : i32
    %0 = arith.cmpi eq, %arg1, %c0_i32 : i32
    %1 = arith.extui %0 : i1 to i32
    %c0_i32_0 = arith.constant 0 : i32
    %2 = arith.cmpi ne, %1, %c0_i32_0 : i32
    scf.if %2 {
      %cst_36 = arith.constant 0.000000e+00 : f32
      %91 = vector.broadcast %cst_36 : f32 to vector<8x8xf32>
      %c0_37 = arith.constant 0 : index
      %c0_38 = arith.constant 0 : index
      %92 = vector.load %arg8[%c0_37, %c0_38] : memref<8x8xf32, #tpu.memory_space<vmem>>, vector<8x8xf32>
      tpu.vector_store %arg8[%c0_37, %c0_38], %91 {strides = array<i32>} : memref<8x8xf32, #tpu.memory_space<vmem>>, vector<8x8xf32>,
    } else {
    }
    %c1_i32 = arith.constant 1 : i32
    %3 = arith.muli %arg0, %c1_i32 : i32
    %4 = arith.addi %3, %arg1 : i32
    %5 = tpu.iota {dimensions = array<i32: 1>} : vector<1x8xi32>
    %c8_i32 = arith.constant 8 : i32
    %6 = arith.muli %4, %c8_i32 : i32
    %7 = vector.broadcast %6 : i32 to vector<1x8xi32>
    %8 = arith.addi %5, %7 : vector<1x8xi32>
    %c8_i32_1 = arith.constant 8 : i32
    %9 = vector.broadcast %c8_i32_1 : i32 to vector<1x8xi32>
    %10 = arith.cmpi slt, %8, %9 : vector<1x8xi32>
    %11 = arith.extui %10 : vector<1x8xi1> to vector<1x8xi32>
    %12 = arith.sitofp %11 : vector<1x8xi32> to vector<1x8xf32>
    %c0 = arith.constant 0 : index
    %c0_2 = arith.constant 0 : index
    %13 = vector.load %arg2[%c0, %c0_2] : memref<3x8xf32, #tpu.memory_space<vmem>>, vector<3x8xf32>
    %14 = vector.extract_strided_slice %13 {offsets = [0, 0], sizes = [1, 8], strides = [1, 1]} : vector<3x8xf32> to vector<1x8xf32>
    %15 = vector.extract_strided_slice %13 {offsets = [1, 0], sizes = [1, 8], strides = [1, 1]} : vector<3x8xf32> to vector<1x8xf32>
    %16 = vector.extract_strided_slice %13 {offsets = [2, 0], sizes = [1, 8], strides = [1, 1]} : vector<3x8xf32> to vector<1x8xf32>
    %cst = arith.constant 0.000000e+00 : f32
    %17 = vector.broadcast %cst : f32 to vector<1x8xf32>
    %18 = arith.maximumf %14, %17 : vector<1x8xf32>
    %19 = arith.mulf %14, %15 : vector<1x8xf32>
    %20 = arith.subf %18, %19 : vector<1x8xf32>
    %21 = math.absf %14 : vector<1x8xf32>
    %cst_3 = arith.constant 0.000000e+00 : f32
    %22 = vector.broadcast %cst_3 : f32 to vector<1x8xf32>
    %23 = arith.subf %22, %21 : vector<1x8xf32>
    %24 = math.exp %23 : vector<1x8xf32>
    %25 = math.log1p %24 : vector<1x8xf32>
    %26 = arith.addf %20, %25 : vector<1x8xf32>
    %c0_4 = arith.constant 0 : index
    %c0_5 = arith.constant 0 : index
    %27 = vector.load %arg3[%c0_4, %c0_5] : memref<7x8xf32, #tpu.memory_space<vmem>>, vector<7x8xf32>
    %cst_6 = arith.constant dense<0xFF800000> : vector<8xf32>
    %28 = vector.multi_reduction <maximumf>, %27, %cst_6 [0] : vector<7x8xf32> to vector<8xf32>
    %29 = vector.shape_cast %28 : vector<8xf32> to vector<1x8xf32>
    %30 = arith.maximumf %29, %16 : vector<1x8xf32>
    %31 = arith.subf %16, %30 : vector<1x8xf32>
    %32 = math.exp %31 : vector<1x8xf32>
    %33 = vector.broadcast %30 : vector<1x8xf32> to vector<7x8xf32>
    %34 = arith.subf %27, %33 : vector<7x8xf32>
    %35 = math.exp %34 : vector<7x8xf32>
    %cst_7 = arith.constant dense<0.000000e+00> : vector<8xf32>
    %36 = vector.multi_reduction <add>, %35, %cst_7 [0] : vector<7x8xf32> to vector<8xf32>
    %37 = vector.shape_cast %36 : vector<8xf32> to vector<1x8xf32>
    %38 = arith.addf %32, %37 : vector<1x8xf32>
    %39 = math.log %38 : vector<1x8xf32>
    %40 = arith.addf %30, %39 : vector<1x8xf32>
    %41 = arith.subf %40, %16 : vector<1x8xf32>
    %c0_8 = arith.constant 0 : index
    %c0_9 = arith.constant 0 : index
    %42 = vector.load %arg4[%c0_8, %c0_9] : memref<16x8xf32, #tpu.memory_space<vmem>>, vector<16x8xf32>
    %c0_10 = arith.constant 0 : index
    %c0_11 = arith.constant 0 : index
    %43 = vector.load %arg5[%c0_10, %c0_11] : memref<16x8xf32, #tpu.memory_space<vmem>>, vector<16x8xf32>
    %cst_12 = arith.constant 0.000000e+00 : f32
    %44 = vector.broadcast %cst_12 : f32 to vector<16x8xf32>
    %45 = arith.maximumf %42, %44 : vector<16x8xf32>
    %46 = arith.mulf %42, %43 : vector<16x8xf32>
    %47 = arith.subf %45, %46 : vector<16x8xf32>
    %48 = math.absf %42 : vector<16x8xf32>
    %cst_13 = arith.constant 0.000000e+00 : f32
    %49 = vector.broadcast %cst_13 : f32 to vector<16x8xf32>
    %50 = arith.subf %49, %48 : vector<16x8xf32>
    %51 = math.exp %50 : vector<16x8xf32>
    %52 = math.log1p %51 : vector<16x8xf32>
    %53 = arith.addf %47, %52 : vector<16x8xf32>
    %cst_14 = arith.constant dense<0.000000e+00> : vector<8xf32>
    %54 = vector.multi_reduction <add>, %53, %cst_14 [0] : vector<16x8xf32> to vector<8xf32>
    %55 = vector.shape_cast %54 : vector<8xf32> to vector<1x8xf32>
    %c0_15 = arith.constant 0 : index
    %c0_16 = arith.constant 0 : index
    %56 = vector.load %arg6[%c0_15, %c0_16] : memref<8x8xf32, #tpu.memory_space<vmem>>, vector<8x8xf32>
    %c0_17 = arith.constant 0 : index
    %c0_18 = arith.constant 0 : index
    %57 = vector.load %arg7[%c0_17, %c0_18] : memref<1x8xi32, #tpu.memory_space<vmem>>, vector<1x8xi32>
    %58 = tpu.iota {dimensions = array<i32: 0>} : vector<8x8xi32>
    %59 = vector.broadcast %57 : vector<1x8xi32> to vector<8x8xi32>
    %60 = arith.cmpi eq, %58, %59 : vector<8x8xi32>
    %cst_19 = arith.constant 0.000000e+00 : f32
    %61 = vector.broadcast %cst_19 : f32 to vector<8x8xf32>
    %62 = arith.select %60, %56, %61 : vector<8x8xi1>, vector<8x8xf32>
    %cst_20 = arith.constant dense<0.000000e+00> : vector<8xf32>
    %63 = vector.multi_reduction <add>, %62, %cst_20 [0] : vector<8x8xf32> to vector<8xf32>
    %64 = vector.shape_cast %63 : vector<8xf32> to vector<1x8xf32>
    %cst_21 = arith.constant dense<0xFF800000> : vector<8xf32>
    %65 = vector.multi_reduction <maximumf>, %56, %cst_21 [0] : vector<8x8xf32> to vector<8xf32>
    %66 = vector.shape_cast %65 : vector<8xf32> to vector<1x8xf32>
    %67 = vector.broadcast %66 : vector<1x8xf32> to vector<8x8xf32>
    %68 = arith.subf %56, %67 : vector<8x8xf32>
    %69 = math.exp %68 : vector<8x8xf32>
    %cst_22 = arith.constant dense<0.000000e+00> : vector<8xf32>
    %70 = vector.multi_reduction <add>, %69, %cst_22 [0] : vector<8x8xf32> to vector<8xf32>
    %71 = vector.shape_cast %70 : vector<8xf32> to vector<1x8xf32>
    %72 = math.log %71 : vector<1x8xf32>
    %73 = arith.addf %66, %72 : vector<1x8xf32>
    %74 = arith.subf %73, %64 : vector<1x8xf32>
    %c0_23 = arith.constant 0 : index
    %c0_24 = arith.constant 0 : index
    %75 = vector.load %arg8[%c0_23, %c0_24] : memref<8x8xf32, #tpu.memory_space<vmem>>, vector<1x8xf32>
    %76 = arith.mulf %26, %12 : vector<1x8xf32>
    %77 = arith.addf %75, %76 : vector<1x8xf32>
    %c0_25 = arith.constant 0 : index
    %c0_26 = arith.constant 0 : index
    %78 = vector.load %arg8[%c0_25, %c0_26] : memref<8x8xf32, #tpu.memory_space<vmem>>, vector<1x8xf32>
    tpu.vector_store %arg8[%c0_25, %c0_26], %77 {strides = array<i32>} : memref<8x8xf32, #tpu.memory_space<vmem>>, vector<1x8xf32>,
    %c1 = arith.constant 1 : index
    %c0_27 = arith.constant 0 : index
    %79 = vector.load %arg8[%c1, %c0_27] : memref<8x8xf32, #tpu.memory_space<vmem>>, vector<1x8xf32>
    %80 = arith.mulf %41, %12 : vector<1x8xf32>
    %81 = arith.addf %79, %80 : vector<1x8xf32>
    %c1_28 = arith.constant 1 : index
    %c0_29 = arith.constant 0 : index
    %82 = vector.load %arg8[%c1_28, %c0_29] : memref<8x8xf32, #tpu.memory_space<vmem>>, vector<1x8xf32>
    tpu.vector_store %arg8[%c1_28, %c0_29], %81 {strides = array<i32>} : memref<8x8xf32, #tpu.memory_space<vmem>>, vector<1x8xf32>,
    %c2 = arith.constant 2 : index
    %c0_30 = arith.constant 0 : index
    %83 = vector.load %arg8[%c2, %c0_30] : memref<8x8xf32, #tpu.memory_space<vmem>>, vector<1x8xf32>
    %84 = arith.mulf %55, %12 : vector<1x8xf32>
    %85 = arith.addf %83, %84 : vector<1x8xf32>
    %c2_31 = arith.constant 2 : index
    %c0_32 = arith.constant 0 : index
    %86 = vector.load %arg8[%c2_31, %c0_32] : memref<8x8xf32, #tpu.memory_space<vmem>>, vector<1x8xf32>
    tpu.vector_store %arg8[%c2_31, %c0_32], %85 {strides = array<i32>} : memref<8x8xf32, #tpu.memory_space<vmem>>, vector<1x8xf32>,
    %c3 = arith.constant 3 : index
    %c0_33 = arith.constant 0 : index
    %87 = vector.load %arg8[%c3, %c0_33] : memref<8x8xf32, #tpu.memory_space<vmem>>, vector<1x8xf32>
    %88 = arith.mulf %74, %12 : vector<1x8xf32>
    %89 = arith.addf %87, %88 : vector<1x8xf32>
    %c3_34 = arith.constant 3 : index
    %c0_35 = arith.constant 0 : index
    %90 = vector.load %arg8[%c3_34, %c0_35] : memref<8x8xf32, #tpu.memory_space<vmem>>, vector<1x8xf32>
    tpu.vector_store %arg8[%c3_34, %c0_35], %89 {strides = array<i32>} : memref<8x8xf32, #tpu.memory_space<vmem>>, vector<1x8xf32>,
    return
  }
  func.func @transform_0(%arg0: i32, %arg1: i32) -> (i32, i32) {
    %c1_i32 = arith.constant 1 : i32
    %0 = arith.muli %arg0, %c1_i32 : i32
    %1 = arith.addi %0, %arg1 : i32
    %c0_i32 = arith.constant 0 : i32
    %c0_i32_0 = arith.constant 0 : i32
    return %c0_i32, %1 : i32, i32
  }
  func.func @transform_1(%arg0: i32, %arg1: i32) -> (i32, i32) {
    %c1_i32 = arith.constant 1 : i32
    %0 = arith.muli %arg0, %c1_i32 : i32
    %1 = arith.addi %0, %arg1 : i32
    %c0_i32 = arith.constant 0 : i32
    %c0_i32_0 = arith.constant 0 : i32
    return %c0_i32, %1 : i32, i32
  }
  func.func @transform_2(%arg0: i32, %arg1: i32) -> (i32, i32) {
    %c1_i32 = arith.constant 1 : i32
    %0 = arith.muli %arg0, %c1_i32 : i32
    %1 = arith.addi %0, %arg1 : i32
    %c0_i32 = arith.constant 0 : i32
    %c0_i32_0 = arith.constant 0 : i32
    return %c0_i32, %1 : i32, i32
  }
  func.func @transform_3(%arg0: i32, %arg1: i32) -> (i32, i32) {
    %c1_i32 = arith.constant 1 : i32
    %0 = arith.muli %arg0, %c1_i32 : i32
    %1 = arith.addi %0, %arg1 : i32
    %c0_i32 = arith.constant 0 : i32
    %c0_i32_0 = arith.constant 0 : i32
    return %c0_i32, %1 : i32, i32
  }
  func.func @transform_4(%arg0: i32, %arg1: i32) -> (i32, i32) {
    %c1_i32 = arith.constant 1 : i32
    %0 = arith.muli %arg0, %c1_i32 : i32
    %1 = arith.addi %0, %arg1 : i32
    %c0_i32 = arith.constant 0 : i32
    %c0_i32_0 = arith.constant 0 : i32
    return %c0_i32, %1 : i32, i32
  }
  func.func @transform_5(%arg0: i32, %arg1: i32) -> (i32, i32) {
    %c1_i32 = arith.constant 1 : i32
    %0 = arith.muli %arg0, %c1_i32 : i32
    %1 = arith.addi %0, %arg1 : i32
    %c0_i32 = arith.constant 0 : i32
    %c0_i32_0 = arith.constant 0 : i32
    return %c0_i32, %1 : i32, i32
  }
  func.func @transform_6(%arg0: i32, %arg1: i32) -> (i32, i32) {
    %c0_i32 = arith.constant 0 : i32
    %c0_i32_0 = arith.constant 0 : i32
    return %arg0, %c0_i32 : i32, i32
  }
}

</mosaic_0001>

<bundles_post_ra>
// kernel: tpu_custom_call.1
= control target key start
LH: loop header
LB: loop body
LE: loop exit
PB: predicated region body
PF: predicated region fallthrough
CT: control target
= control target key end

     0   :  { %vm127_vm0 = vcmask 64512   ;;  %v394_v2 = vmov 0.0   ;;  %vm160_vm1 = vcmask 63488   ;;  %s531_s0 = inlined_call_operand.vmem [shape: f32[3,8], index: 0, kind: input, shape index: {}]   ;;  %s532_s1 = inlined_call_operand.vmem [shape: f32[7,8], index: 1, kind: input, shape index: {}]   ;;  %s533_s2 = inlined_call_operand.vmem [shape: f32[16,8], index: 2, kind: input, shape index: {}]   ;;  %s534_s3 = inlined_call_operand.vmem [shape: f32[16,8], index: 3, kind: input, shape index: {}]   ;;  %s535_s4 = inlined_call_operand.vmem [shape: f32[8,8], index: 4, kind: input, shape index: {}]   ;;  %s536_s5 = inlined_call_operand.vmem [shape: s32[1,8], index: 5, kind: input, shape index: {}]   ;;  %s537_s6 = inlined_call_operand.hbm [shape: f32[8,8], index: 6, kind: output, shape index: {}]  }
   0x1   :  { %v434_v0 = vld [vmem:[%s531_s0] sm:$0x7]  ;;  %128 = vst.msk [vmem:[#allocation2] sm:$0xff] %vm127_vm0, %v394_v2  ;;  %v451_v8 = vld [vmem:[%s533_s2 + $0x8] sm:$0xff] }
   0x2   :  { %v159_v1 = vld [vmem:[%s532_s1] sm:$0x7f]  ;;  %v145_v3 = vand.u32 2147483647, %v434_v0 }
   0x3   :  { %v161_v4 = vsel %vm160_vm1, %v159_v1, -inf  ;;  %v446_v7 = vld [vmem:[%s533_s2] sm:$0xff] }
   0x4   :  { %v146_v5 = vsub.f32 0.0, %v145_v3  ;;  %v162_v6 = vrot.slane %v161_v4, 4  ;;  %v456_v9 = vld [vmem:[%s535_s4] sm:$0xff] }
   0x5   :  { %11 = vsyncpa [#allocation3], 0  ;;  %v130_v10 = vlaneseq  ;;  %v201_v13 = vand.u32 2147483647, %v446_v7  ;;  %v202_v14 = vand.u32 2147483647, %v451_v8 }
   0x6   :  { %v147_v11 = vmul.f32 1.442695, %v146_v5  ;;  %v163_v12 = vmax.f32 %v161_v4, %v162_v6  ;;  %v256_v16 = vsel %vm127_vm0, %v456_v9, -inf  ;;  %v141_v37 = vrot.slane %v434_v0, 1  ;;  %v193_v52 = vld [vmem:[%s534_s3] sm:$0xff]  ;;  %v194_v56 = vld [vmem:[%s534_s3 + $0x8] sm:$0xff] }
   0x7   :  { %v203_v17 = vsub.f32 0.0, %v201_v13  ;;  %v204_v18 = vsub.f32 0.0, %v202_v14  ;;  %v462_v20 = vshrl.u32 %v130_v10, 7  ;;  %v257_v21 = vrot.slane %v256_v16, 4  ;;  %v345_v59 = vld [vmem:[%s536_s5] ss:$0 sm:$0xff] }
   0x8   :  { %348 = vpow2.f32 %v147_v11  ;;  %v164_v15 = vrot.slane %v163_v12, 2  ;;  %v139_v44 = vmax.f32 %v434_v0, 0.0  ;;  %v131_v47 = vand.u32 127, %v130_v10  ;;  %s395_s3 = smov [#allocation2]  }
   0x9   :  { %v205_v22 = vmul.f32 1.442695, %v203_v17  ;;  %v207_v23 = vmul.f32 1.442695, %v204_v18  ;;  %v258_v25 = vmax.f32 %v256_v16, %v257_v21  ;;  %v174_v27 = vsub.s32 2, %v462_v20  ;;  %s303_s5 = sshll.u32 %s395_s3, 4  ;;  %s304_s5 = int_to_ptr.vmem [resolvable:$true] %s303_s5 }
   0xa   :  { %v165_v19 = vmax.f32 %v163_v12, %v164_v15  ;;  %v143_v48 = vmul.f32 %v141_v37, %v434_v0  ;;  %vm135_vm2 = vcmp.lt.s32.totalorder %v131_v47, 8  ;;  %v195_v57 = vmax.f32 %v446_v7, 0.0  ;;  %v277_v21 = vld [vmem:[#allocation2] sm:$0x1]  ;;  %s370_s9 = scalar_lea.vmem %s304_s5, 128  ;;  %p375_p1 = scmp.lt.s32.totalorder %s304_s5, %s304_s5 }
   0xb   :  { %350 = vpow2.f32 %v205_v22  ;;  %v259_v28 = vrot.slane %v258_v25, 2  ;;  %v197_v58 = vmul.f32 %v193_v52, %v446_v7  ;;  %v196_v5 = vmax.f32 %v451_v8, 0.0  ;;  %p371_p0 = scmp.ne.s32.totalorder %s304_s5, %s370_s9  ;;  %p376_p2 = scmp.lt.s32.totalorder %s370_s9, %s370_s9 }
   0xc   :  { %v166_v24 = vrot.slane %v165_v19, 1  ;;  %352 = vpow2.f32 %v207_v23  ;;  %v144_v61 = vsub.f32 %v139_v44, %v143_v48  ;;  %v198_v6 = vmul.f32 %v194_v56, %v451_v8 }
   0xd   :  { %v260_v30 = vmax.f32 %v258_v25, %v259_v28  ;;  %vm247_vm4 = vcmp.eq.s32.totalorder %v462_v20, %v345_v59  ;;  %v494_v11 = vsel %vm135_vm2, 1.0, %v394_v2  ;;  %v199_v13 = vsub.f32 %v195_v57, %v197_v58  ;;  %p377_p3 = por %p376_p2, %p375_p1 }
   0xe   :  { %v167_v26 = vmax.f32 %v165_v19, %v166_v24  ;;  %v248_v20 = vsel %vm247_vm4, %v456_v9, 0.0  ;;  %v200_v2 = vsub.f32 %v196_v5, %v198_v6  ;;  %vm280_vm7 = vcmask 57344  }
   0xf   :  { %v261_v33 = vrot.slane %v260_v30, 1  ;;  %p378_p4 = pnand %p377_p3, %p371_p0 }
  0x10   :  { %v466_v29 = vmax.f32 %v167_v26, %v434_v0 }
  0x11   :  { %v469_v36 = vmax.f32 %v260_v30, %v261_v33  ;;  %v249_v30 = vsel %vm127_vm0, %v248_v20, 0.0 }
  0x12   :  { %v349_v31 = vpop.eup %348  ;;  %v175_v32 = vrot.slane %v466_v29, %v174_v27  ;;  %v169_v51 = vsub.f32 %v434_v0, %v466_v29 }
  0x13   :  { %v149_v34 = vadd.f32 1.0, %v349_v31  ;;  %v152_v38 = vmul.f32 -0.5, %v349_v31  ;;  %v263_v40 = vsub.f32 %v456_v9, %v469_v36  ;;  %v155_v50 = vand.u32 2147483647, %v349_v31 }
  0x14   :  { %v176_v35 = vsub.f32 %v159_v1, %v175_v32  ;;  %v170_v62 = vmul.f32 1.442695, %v169_v51 }
  0x15   :  { %354 = vlog2.f32 %v149_v34  ;;  %v351_v41 = vpop.eup %350  ;;  %v264_v46 = vmul.f32 1.442695, %v263_v40  ;;  %v153_v49 = vadd.f32 1.0, %v152_v38  ;;  %vm156_vm3 = vcmp.lt.f32.partialorder %v155_v50, 0.0004427343 }
  0x16   :  { %v177_v39 = vmul.f32 1.442695, %v176_v35  ;;  %v353_v42 = vpop.eup %352  ;;  %v209_v43 = vadd.f32 1.0, %v351_v41  ;;  %v212_v53 = vmul.f32 -0.5, %v351_v41  ;;  %v215_v3 = vand.u32 2147483647, %v351_v41 }
  0x17   :  { %v218_v45 = vadd.f32 1.0, %v353_v42  ;;  %v221_v54 = vmul.f32 -0.5, %v353_v42  ;;  %v154_v55 = vmul.f32 %v349_v31, %v153_v49  ;;  %v224_v10 = vand.u32 2147483647, %v353_v42 }
  0x18   :  { %356 = vpow2.f32 %v177_v39  ;;  %v213_v63 = vadd.f32 1.0, %v212_v53  ;;  %vm497_vm5 = vcmp.lt.f32.partialorder %v215_v3, 0.0004427343 }
  0x19   :  { %358 = vlog2.f32 %v209_v43  ;;  %v222_v4 = vadd.f32 1.0, %v221_v54  ;;  %vm225_vm6 = vcmp.lt.f32.partialorder %v224_v10, 0.0004427343 }
  0x1a   :  { %360 = vlog2.f32 %v218_v45  ;;  %v214_v16 = vmul.f32 %v351_v41, %v213_v63 }
  0x1b   :  { %362 = vpow2.f32 %v264_v46  ;;  %v223_v8 = vmul.f32 %v353_v42, %v222_v4  ;;  %v250_v42 = vrot.slane %v249_v30, 4 }
  0x1c   :  { %364 = vpow2.f32 %v170_v62 }
  0x1d   :  { %v251_v50 = vadd.f32 %v250_v42, %v249_v30 }
  0x1f   :  { %v355_v60 = vpop.eup %354  ;;  %v252_v56 = vrot.slane %v251_v50, 2 }
  0x20   :  { %v151_v1 = vmul.f32 0.6931472, %v355_v60 }
  0x21   :  { %v253_v59 = vadd.f32 %v252_v56, %v251_v50 }
  0x22   :  { %v357_v7 = vpop.eup %356  ;;  %v157_v12 = vsel %vm156_vm3, %v154_v55, %v151_v1 }
  0x23   :  { %v158_v14 = vadd.f32 %v157_v12, %v144_v61  ;;  %v179_v15 = vsel %vm160_vm1, %v357_v7, 0.0  ;;  %v359_v17 = vpop.eup %358  ;;  %v289_v61 = vld [vmem:[#allocation2 + $0x2] sm:$0x1]  ;;  %v254_v63 = vrot.slane %v253_v59, 1 }
  0x24   :  { %v180_v18 = vrot.slane %v179_v15, 4  ;;  %v361_v22 = vpop.eup %360  ;;  %v211_v23 = vmul.f32 0.6931472, %v359_v17  ;;  %v293_v17 = vld [vmem:[#allocation2 + $0x3] sm:$0x1] }
  0x25   :  { %v278_v24 = vmul.f32 %v494_v11, %v158_v14  ;;  %v363_v25 = vpop.eup %362  ;;  %v220_v27 = vmul.f32 0.6931472, %v361_v22  ;;  %v255_v10 = vadd.f32 %v254_v63, %v253_v59 }
  0x26   :  { %v181_v26 = vadd.f32 %v180_v18, %v179_v15  ;;  %v217_v28 = vsel %vm497_vm5, %v214_v16, %v211_v23  ;;  %v266_v31 = vsel %vm127_vm0, %v363_v25, 0.0  ;;  %v365_v46 = vpop.eup %364  ;;  %v282_v16 = vld [vmem:[#allocation2 + $0x1] sm:$0x1] }
  0x27   :  { %v279_v32 = vadd.f32 %v278_v24, %v277_v21  ;;  %v226_v33 = vsel %vm225_vm6, %v223_v8, %v220_v27  ;;  %v227_v34 = vadd.f32 %v217_v28, %v199_v13  ;;  %v267_v35 = vrot.slane %v266_v31, 4 }
  0x28   :  { %v182_v9 = vrot.slane %v181_v26, 2  ;;  %v228_v37 = vadd.f32 %v226_v33, %v200_v2 }
  0x29   :  { %281 = vst.msk [vmem:[#allocation2] sm:$0x1] %vm280_vm7, %v279_v32  ;;  %v230_v39 = vsel %vm127_vm0, %v227_v34, 0.0  ;;  %v268_v40 = vadd.f32 %v267_v35, %v266_v31 }
  0x2a   :  { %v183_v38 = vadd.f32 %v182_v9, %v181_v26  ;;  %v231_v41 = vsel %vm127_vm0, %v228_v37, 0.0 }
  0x2b   :  { %v232_v44 = vadd.f32 %v231_v41, %v230_v39  ;;  %v269_v45 = vrot.slane %v268_v40, 2 }
  0x2c   :  { %v184_v43 = vrot.slane %v183_v38, 1 }
  0x2d   :  { %v233_v48 = vrot.slane %v232_v44, 4  ;;  %v270_v49 = vadd.f32 %v269_v45, %v268_v40 }
  0x2e   :  { %v185_v47 = vadd.f32 %v184_v43, %v183_v38 }
  0x2f   :  { %v234_v52 = vadd.f32 %v233_v48, %v232_v44  ;;  %v271_v53 = vrot.slane %v270_v49, 1 }
  0x30   :  { %v186_v51 = vadd.f32 %v365_v46, %v185_v47 }
  0x31   :  { %v235_v54 = vrot.slane %v234_v52, 2  ;;  %v272_v55 = vadd.f32 %v271_v53, %v270_v49 }
  0x32   :  { %366 = vlog2.f32 %v186_v51 }
  0x33   :  { %v236_v57 = vadd.f32 %v235_v54, %v234_v52  ;;  %368 = vlog2.f32 %v272_v55 }
  0x35   :  { %v237_v58 = vrot.slane %v236_v57, 1 }
  0x37   :  { %v238_v60 = vadd.f32 %v237_v58, %v236_v57 }
  0x39   :  { %v290_v62 = vmul.f32 %v494_v11, %v238_v60 }
  0x3b   :  { %v291_v3 = vadd.f32 %v290_v62, %v289_v61 }
  0x3c   :  { %v367_v1 = vpop.eup %366 }
  0x3d   :  { %v188_v4 = vmul.f32 0.6931472, %v367_v1  ;;  %v369_v5 = vpop.eup %368  ;;  %292 = vst.msk [vmem:[#allocation2 + $0x2] sm:$0x1] %vm280_vm7, %v291_v3 }
  0x3e   :  { %v274_v7 = vmul.f32 0.6931472, %v369_v5 }
  0x3f   :  { %v189_v6 = vadd.f32 %v188_v4, %v466_v29 }
  0x40   :  { %v275_v13 = vadd.f32 %v274_v7, %v469_v36 }
  0x41   :  { %v190_v12 = vsub.f32 %v189_v6, %v434_v0 }
  0x42   :  { %v276_v14 = vsub.f32 %v275_v13, %v255_v10 }
  0x43   :  { %v283_v15 = vmul.f32 %v494_v11, %v190_v12 }
  0x44   :  { %v294_v19 = vmul.f32 %v494_v11, %v276_v14 }
  0x45   :  { %v285_v18 = vrot.slane %v283_v15, 2 }
  0x46   :  { %v295_v20 = vadd.f32 %v294_v19, %v293_v17 }
  0x47   :  { %v287_v8 = vadd.f32 %v285_v18, %v282_v16 }
  0x48   :  { %296 = vst.msk [vmem:[#allocation2 + $0x3] sm:$0x1] %vm280_vm7, %v295_v20 }
  0x49   :  { %288 = vst.msk [vmem:[#allocation2 + $0x1] sm:$0x1] %vm280_vm7, %v287_v8 }
  0x4a   :  { %381 = shalt.err (!%p378_p4)
}
  0x4b   :  { %s382_s12 = scalar_lea.hbm %s537_s6, 128 }
  0x4c   :  { %p383_p5 = scmp.ne.s32.totalorder %s537_s6, %s382_s12  ;;  %p386_p6 = scmp.lt.u32.totalorder %s382_s12, %s537_s6 }
  0x4e   :  { %p388_p7 = pnand %p386_p6, %p383_p5 }
  0x50   :  { %391 = shalt.err (!%p388_p7)
}
  0x51   :  { %306 = dma.vmem_to_hbm [thread:$0]  %s304_s5, 128, %s537_s6, [#allocation3]  }
  0x52   :  { %392 = dma.done.wait [#allocation3], 128  }
  0x53   :  { %393 = vsyncadd [#allocation3], 4294967168 }
  0x54   :  { %310 = vsyncpa [#allocation3], 1 }

</bundles_post_ra>
